<compile_context>
chip_gen: v5e
topology: v5e:2x2
jax: 0.10.0
libtpu: 0.0.40
codegen_flags: <defaults>
</compile_context>

<pallas_src>
import functools
import math

import jax
import jax.numpy as jnp
from jax.experimental import pallas as pl
from jax.experimental.pallas import tpu as pltpu

_VMEM_LIMIT = 64 * 1024 * 1024  # scoped-VMEM cap; actual usage at these tiles is far below.


# ----------------------------------------------------------------------------
# Tiling helper
# ----------------------------------------------------------------------------

def _tile(dim, preferred, align):
    """Largest multiple of `align` that divides `dim` and is <= preferred (else dim)."""
    if dim <= preferred:
        return dim
    t = (preferred // align) * align
    while t >= align:
        if dim % t == 0:
            return t
        t -= align
    # TODO(synk): for huge dims with no aligned divisor, pad M/N instead of falling back
    # to the full dim (matters for v7x's 64 MiB VMEM); irrelevant for these shapes.
    return dim


def _erf_gelu(x):
    # Exact GELU (PyTorch nn.GELU default); erf runs on the EUP.
    return x * 0.5 * (1.0 + jax.lax.erf(x * (1.0 / math.sqrt(2.0))))


# ----------------------------------------------------------------------------
# Fused (LayerNorm) -> matmul -> bias -> (GELU) -> (residual) kernel
# ----------------------------------------------------------------------------

def _fused_matmul_kernel(*refs, ln, eps, activation, residual):
    i = 0
    x_ref = refs[i]; i += 1
    if ln:
        g_ref, bln_ref = refs[i], refs[i + 1]; i += 2
    w_ref, b_ref = refs[i], refs[i + 1]; i += 2
    r_ref = None
    if residual:
        r_ref = refs[i]; i += 1
    o_ref = refs[i]; i += 1
    xs_ref = refs[i] if ln else None          # bf16 VMEM scratch (tm, K)

    if ln:
        # LayerNorm once per row tile (j == 0); reused for every N tile of this row tile.
        @pl.when(pl.program_id(1) == 0)
        def _():
            x = x_ref[...].astype(jnp.float32)
            mean = jnp.mean(x, axis=-1, keepdims=True)
            xc = x - mean
            var = jnp.mean(xc * xc, axis=-1, keepdims=True)       # biased var (PyTorch LN)
            xn = xc * jax.lax.rsqrt(var + eps)
            xn = xn * g_ref[...].astype(jnp.float32) + bln_ref[...].astype(jnp.float32)
            xs_ref[...] = xn.astype(jnp.bfloat16)
        xb = xs_ref[...]
    else:
        xb = x_ref[...].astype(jnp.bfloat16)

    # bf16 MXU operands, f32 accumulation.
    acc = jnp.dot(xb, w_ref[...].astype(jnp.bfloat16),
                  preferred_element_type=jnp.float32)
    acc = acc + b_ref[...].astype(jnp.float32)
    if activation == "gelu":
        acc = _erf_gelu(acc)
    if residual:
        acc = acc + r_ref[...].astype(jnp.float32)
    o_ref[...] = acc.astype(o_ref.dtype)


def fused_matmul(x, w, b, *, ln=None, eps=1e-6, activation=None, residual=None,
                 tm_pref=256, tn_pref=256):
    """x: (M, K), w: (K, N) (already transposed vs PyTorch Linear), b: (N,).

    Tiled over (M, N); K stays whole per block so the LayerNorm over the row can be fused.
    """
    M, K = x.shape
    N = w.shape[1]
    tm = _tile(M, tm_pref, 8)
    tn = _tile(N, tn_pref, 128)
    grid = (M // tm, N // tn)

    in_specs = [pl.BlockSpec((tm, K), lambda i, j: (i, 0))]
    args = [x]
    if ln is not None:
        gamma, beta = ln
        in_specs += [pl.BlockSpec((1, K), lambda i, j: (0, 0)),
                     pl.BlockSpec((1, K), lambda i, j: (0, 0))]
        args += [gamma.reshape(1, K), beta.reshape(1, K)]
    # TODO(synk): sweep pipeline_mode=pl.Buffered(3) on the (K, tn) weight spec once
    # DMA exposure is measured; default double buffering kept here.
    in_specs += [pl.BlockSpec((K, tn), lambda i, j: (0, j)),
                 pl.BlockSpec((1, tn), lambda i, j: (0, j))]
    args += [w, b.reshape(1, N)]
    if residual is not None:
        in_specs += [pl.BlockSpec((tm, tn), lambda i, j: (i, j))]
        args += [residual]

    scratch = [pltpu.VMEM((tm, K), jnp.bfloat16)] if ln is not None else []
    # With LN scratch, the j axis carries state -> "arbitrary"; otherwise fully parallel.
    dims = ("parallel", "arbitrary") if ln is not None else ("parallel", "parallel")

    kernel = functools.partial(_fused_matmul_kernel, ln=ln is not None, eps=eps,
                               activation=activation, residual=residual is not None)
    return pl.pallas_call(
        kernel,
        grid=grid,
        in_specs=in_specs,
        out_specs=pl.BlockSpec((tm, tn), lambda i, j: (i, j)),
        out_shape=jax.ShapeDtypeStruct((M, N), x.dtype),
        scratch_shapes=scratch,
        compiler_params=pltpu.CompilerParams(
            dimension_semantics=dims, vmem_limit_bytes=_VMEM_LIMIT),
    )(*args)


# ----------------------------------------------------------------------------
# Multi-head self-attention (all heads of one batch element per grid step)
# ----------------------------------------------------------------------------

def _attention_kernel(qkv_ref, o_ref, *, heads, head_dim, scale):
    C = heads * head_dim
    for h in range(heads):                                # heads is small; static unroll
        lo = h * head_dim
        q = (qkv_ref[0, :, lo:lo + head_dim].astype(jnp.float32) * scale).astype(jnp.bfloat16)
        k = qkv_ref[0, :, C + lo:C + lo + head_dim].astype(jnp.bfloat16)
        v = qkv_ref[0, :, 2 * C + lo:2 * C + lo + head_dim].astype(jnp.bfloat16)
        s = jax.lax.dot_general(q, k, (((1,), (1,)), ((), ())),
                                preferred_element_type=jnp.float32)   # (N, N) f32
        s = s - jnp.max(s, axis=-1, keepdims=True)
        p = jnp.exp(s)
        p = p / jnp.sum(p, axis=-1, keepdims=True)        # exact softmax denominator
        o = jnp.dot(p.astype(jnp.bfloat16), v, preferred_element_type=jnp.float32)
        o_ref[0, :, lo:lo + head_dim] = o.astype(o_ref.dtype)   # per-head store, no concat


def attention(qkv, heads):
    """qkv: (B, N, 3C) in timm layout (q | k | v, heads-major within each) -> (B, N, C)."""
    B, N, C3 = qkv.shape
    C = C3 // 3
    hd = C // heads
    return pl.pallas_call(
        functools.partial(_attention_kernel, heads=heads, head_dim=hd, scale=hd ** -0.5),
        grid=(B,),
        in_specs=[pl.BlockSpec((1, N, C3), lambda b: (b, 0, 0))],
        out_specs=pl.BlockSpec((1, N, C), lambda b: (b, 0, 0)),
        out_shape=jax.ShapeDtypeStruct((B, N, C), qkv.dtype),
        compiler_params=pltpu.CompilerParams(
            dimension_semantics=("parallel",), vmem_limit_bytes=_VMEM_LIMIT),
    )(qkv)
    # TODO(synk): for long sequences add a heads grid axis with DMA-level head slicing
    # and flash-style KV tiling so the (N, N) scores are never fully materialized.


# ----------------------------------------------------------------------------
# Patch embedding (+ positional embedding, no batch-broadcast in HBM)
# ----------------------------------------------------------------------------

def _embed_kernel(cols_ref, w_ref, b_ref, pos_ref, o_ref):
    x = cols_ref[0].astype(jnp.bfloat16)                  # (P, Cin*k*k)
    acc = jnp.dot(x, w_ref[...].astype(jnp.bfloat16),
                  preferred_element_type=jnp.float32)
    acc = acc + b_ref[...].astype(jnp.float32) + pos_ref[...].astype(jnp.float32)
    o_ref[0] = acc.astype(o_ref.dtype)


def _extract_patches(x, ksize, stride, padding):
    """x: (B, C, H, W) -> (B, C, Ho, Wo, ksize*ksize), kernel index order (kh, kw)."""
    B, C, H, W = x.shape
    xp = jnp.pad(x, ((0, 0), (0, 0), (padding, padding), (padding, padding)))
    Ho = (H + 2 * padding - ksize) // stride + 1
    Wo = (W + 2 * padding - ksize) // stride + 1
    cols = []
    for kh in range(ksize):
        for kw in range(ksize):
            cols.append(xp[:, :, kh:kh + stride * Ho:stride, kw:kw + stride * Wo:stride])
    return jnp.stack(cols, axis=-1), Ho, Wo


def conv2d_embed_tokens(x, w, b, stride, pos_embed):
    """Patch embedding + positional embedding, producing tokens (B, Ho*Wo, Cout)."""
    B, Cin, H, W = x.shape
    Cout, _, k, _ = w.shape
    patches, Ho, Wo = _extract_patches(x, k, stride, 0)   # (B, Cin, Ho, Wo, k*k)
    P = Ho * Wo
    Kk = Cin * k * k
    cols = patches.transpose(0, 2, 3, 1, 4).reshape(B, P, Kk)
    wf = w.reshape(Cout, Kk).T                            # (Kk, Cout)
    pos = pos_embed.reshape(Cout, P).T                    # (P, Cout); index_map ignores batch
    tn = _tile(Cout, 256, 128)
    y = pl.pallas_call(
        _embed_kernel,
        grid=(B, Cout // tn),
        in_specs=[pl.BlockSpec((1, P, Kk), lambda b_, j: (b_, 0, 0)),
                  pl.BlockSpec((Kk, tn), lambda b_, j: (0, j)),
                  pl.BlockSpec((1, tn), lambda b_, j: (0, j)),
                  pl.BlockSpec((P, tn), lambda b_, j: (0, j))],
        out_specs=pl.BlockSpec((1, P, tn), lambda b_, j: (b_, 0, j)),
        out_shape=jax.ShapeDtypeStruct((B, P, Cout), x.dtype),
        compiler_params=pltpu.CompilerParams(
            dimension_semantics=("parallel", "parallel"), vmem_limit_bytes=_VMEM_LIMIT),
    )(cols, wf, b.reshape(1, Cout), pos)
    return y, Ho, Wo


# ----------------------------------------------------------------------------
# Depthwise (grouped) pooling conv: fused VPU kernel, no im2col blowup
# ----------------------------------------------------------------------------

def _dwpool_kernel(x_ref, w_ref, b_ref, o_ref, *, k, stride, Ho, Wo, mult):
    # x_ref: (1, stride*stride, Hq, Wq, Cin) phase-decomposed, zero-padded NHWC input.
    # w_ref: (k*k, mult, Cin), b_ref: (mult, Cin), o_ref: (1, mult, Ho, Wo, Cin).
    cin = x_ref.shape[-1]
    w = w_ref[...].astype(jnp.float32)
    bias = b_ref[...].astype(jnp.float32)
    for m in range(mult):
        acc = jnp.zeros((Ho, Wo, cin), jnp.float32) + bias[m]
        for kh in range(k):
            for kw in range(k):
                ph = (kh % stride) * stride + (kw % stride)
                tap = x_ref[0, ph,
                            kh // stride:kh // stride + Ho,
                            kw // stride:kw // stride + Wo, :].astype(jnp.float32)
                acc = acc + tap * w[kh * k + kw, m]       # VPU MAC, lane = Cin
        o_ref[0, m] = acc.astype(o_ref.dtype)


def conv_head_pooling(x_tok, H, W, w, b, stride):
    """Grouped conv (groups=Cin), kernel=stride+1, pad=stride//2, on token input."""
    B, P, Cin = x_tok.shape
    Cout = w.shape[0]
    k = w.shape[-1]
    mult = Cout // Cin
    pad = stride // 2
    Ho = (H + 2 * pad - k) // stride + 1
    Wo = (W + 2 * pad - k) // stride + 1
    Hp, Wp = H + 2 * pad, W + 2 * pad
    Hq, Wq = -(-Hp // stride), -(-Wp // stride)

    # Tokens are already NHWC order: reshape (free), pad, phase-split (input-sized copies
    # only -- no 9x window materialization).
    x = x_tok.reshape(B, H, W, Cin)
    xp = jnp.pad(x, ((0, 0),
                     (pad, Hq * stride - H - pad),
                     (pad, Wq * stride - W - pad),
                     (0, 0)))
    xph = xp.reshape(B, Hq, stride, Wq, stride, Cin).transpose(0, 2, 4, 1, 3, 5)
    xph = xph.reshape(B, stride * stride, Hq, Wq, Cin)

    wr = w.reshape(Cin, mult, k * k).transpose(2, 1, 0)   # (k*k, mult, Cin); out ch = i*mult+m
    br = b.reshape(Cin, mult).T                           # (mult, Cin)

    y = pl.pallas_call(
        functools.partial(_dwpool_kernel, k=k, stride=stride, Ho=Ho, Wo=Wo, mult=mult),
        grid=(B,),
        in_specs=[pl.BlockSpec((1, stride * stride, Hq, Wq, Cin),
                               lambda i: (i, 0, 0, 0, 0)),
                  pl.BlockSpec((k * k, mult, Cin), lambda i: (0, 0, 0)),
                  pl.BlockSpec((mult, Cin), lambda i: (0, 0))],
        out_specs=pl.BlockSpec((1, mult, Ho, Wo, Cin), lambda i: (i, 0, 0, 0, 0)),
        out_shape=jax.ShapeDtypeStruct((B, mult, Ho, Wo, Cin), x_tok.dtype),
        compiler_params=pltpu.CompilerParams(
            dimension_semantics=("parallel",), vmem_limit_bytes=_VMEM_LIMIT),
    )(xph, wr, br)

    # (B, mult, Ho, Wo, Cin) -> tokens (B, Ho*Wo, Cout) with out-channel index i*mult+m.
    y = y.transpose(0, 2, 3, 4, 1).reshape(B, Ho * Wo, Cout)
    return y, Ho, Wo


# ----------------------------------------------------------------------------
# Global-average-pool + classifier head (fused)
# ----------------------------------------------------------------------------

def _gap_head_kernel(x_ref, w_ref, b_ref, o_ref):
    x = x_ref[...].astype(jnp.float32)                    # (B, P, C)
    pooled = jnp.mean(x, axis=1)                          # (B, C)
    logits = jnp.dot(pooled.astype(jnp.bfloat16), w_ref[...].astype(jnp.bfloat16),
                     preferred_element_type=jnp.float32) + b_ref[...].astype(jnp.float32)
    o_ref[...] = logits.astype(o_ref.dtype)


def gap_head(x_tok, w, b):
    B, P, C = x_tok.shape
    N = w.shape[1]
    # TODO(synk): pad num_classes to 128 lanes for a dense store on v5e; negligible here.
    return pl.pallas_call(
        _gap_head_kernel,
        out_shape=jax.ShapeDtypeStruct((B, N), x_tok.dtype),
    )(x_tok, w, b.reshape(1, N))


# ----------------------------------------------------------------------------
# Transformer block / stage (timm-style Block: pre-LN, MHSA, MLP, residuals)
# ----------------------------------------------------------------------------

def transformer_block(x, p):
    """x: (B, N, C). Dropout / DropPath are identity (rates = 0)."""
    B, N, C = x.shape
    xf = x.reshape(B * N, C)

    # attention branch: LN1 fused into the QKV projection, residual fused into proj
    qkv = fused_matmul(xf, p["wqkv"], p["bqkv"], ln=(p["ln1_g"], p["ln1_b"]))
    o = attention(qkv.reshape(B, N, 3 * C), heads=p["heads"])        # (B, N, C)
    xf = fused_matmul(o.reshape(B * N, C), p["wproj"], p["bproj"], residual=xf)

    # MLP branch: LN2 + fc1 + exact-erf GELU fused; residual fused into fc2
    h = fused_matmul(xf, p["w1"], p["b1"], ln=(p["ln2_g"], p["ln2_b"]), activation="gelu")
    xf = fused_matmul(h, p["w2"], p["b2"], residual=xf)

    return xf.reshape(B, N, C)


def transformer_stage(x_tok, blocks_params):
    for bp in blocks_params:
        x_tok = transformer_block(x_tok, bp)
    return x_tok


# ----------------------------------------------------------------------------
# Full model forward
# ----------------------------------------------------------------------------

def pooling_transformer_forward(x, params, *, stride):
    # patch embedding + positional embedding (pos dropout with p=0 -> identity)
    x_tok, H, W = conv2d_embed_tokens(x, params["patch_w"], params["patch_b"],
                                      stride=stride, pos_embed=params["pos_embed"])
    features = [x_tok]

    n_stages = len(params["stages"])
    for stage in range(n_stages - 1):
        x_tok = transformer_stage(x_tok, params["stages"][stage])
        features.append(x_tok)
        pw = params["pools"][stage]
        x_tok, H, W = conv_head_pooling(x_tok, H, W, pw["w"], pw["b"], stride=2)
    x_tok = transformer_stage(x_tok, params["stages"][-1])
    features.append(x_tok)

    # head (pool_type='cap'): Linear(channels[-1], num_classes) on spatial mean
    logits = gap_head(features[-1], params["head_w"], params["head_b"])
    return logits


# ----------------------------------------------------------------------------
# Deterministic synthetic parameter initialization
# ----------------------------------------------------------------------------

def init_pit_params(key, *, image_size, patch_size, stride, base_dims, depth,
                    heads, mlp_ratio, num_classes, in_chans):
    width = math.floor((image_size - patch_size) / stride + 1)
    dims = [bd * h for bd, h in zip(base_dims, heads)]
    keys = iter(jax.random.split(key, 512))

    def nrm(shape, std=0.02):
        return jax.random.normal(next(keys), shape, jnp.float32) * std

    params = {
        "patch_w": nrm((dims[0], in_chans, patch_size, patch_size)),
        "patch_b": jnp.zeros((dims[0],), jnp.float32),
        "pos_embed": nrm((1, dims[0], width, width)),
    }

    stages = []
    for s in range(len(depth)):
        C = dims[s]
        hidden = int(C * mlp_ratio)
        blocks = []
        for _ in range(depth[s]):
            blocks.append(dict(
                heads=heads[s],
                ln1_g=jnp.ones((C,), jnp.float32), ln1_b=jnp.zeros((C,), jnp.float32),
                wqkv=nrm((C, 3 * C)), bqkv=jnp.zeros((3 * C,), jnp.float32),
                wproj=nrm((C, C)), bproj=jnp.zeros((C,), jnp.float32),
                ln2_g=jnp.ones((C,), jnp.float32), ln2_b=jnp.zeros((C,), jnp.float32),
                w1=nrm((C, hidden)), b1=jnp.zeros((hidden,), jnp.float32),
                w2=nrm((hidden, C)), b2=jnp.zeros((C,), jnp.float32),
            ))
        stages.append(blocks)
    params["stages"] = stages

    pools = []
    for s in range(len(heads) - 1):
        cout = dims[s + 1]
        pools.append(dict(w=nrm((cout, 1, 3, 3)), b=jnp.zeros((cout,), jnp.float32)))
    params["pools"] = pools

    params["head_w"] = nrm((dims[-1], num_classes))
    params["head_b"] = jnp.zeros((num_classes,), jnp.float32)
    return params


# ----------------------------------------------------------------------------
# Main
# ----------------------------------------------------------------------------

if __name__ == "__main__":
    cfg = dict(
        image_size=16, patch_size=4, stride=4,
        base_dims=[8, 8], depth=[1, 1], heads=[2, 4],
        mlp_ratio=2, num_classes=10, in_chans=3,
    )
    key = jax.random.PRNGKey(0)
    kp, kx = jax.random.split(key)
    params = init_pit_params(kp, **cfg)

    x = jax.random.normal(kx, (2, cfg["in_chans"], cfg["image_size"], cfg["image_size"]),
                          jnp.float32)

    logits = pooling_transformer_forward(x, params, stride=cfg["stride"])
    jax.block_until_ready(logits)
    assert logits.shape == (2, cfg["num_classes"])
    print("KERNEL_OK")
</pallas_src>

<mosaic_0001>
module attributes {stable_mosaic.version = 11 : i64} {
  func.func @_embed_kernel(%arg0: i32, %arg1: i32, %arg2: memref<1x16x48xf32, #tpu.memory_space<vmem>>, %arg3: memref<48x16xf32, #tpu.memory_space<vmem>>, %arg4: memref<1x16xf32, #tpu.memory_space<vmem>>, %arg5: memref<16x16xf32, #tpu.memory_space<vmem>>, %arg6: memref<1x16x16xf32, #tpu.memory_space<vmem>>) attributes {dimension_semantics = [#tpu.dimension_semantics<parallel>, #tpu.dimension_semantics<parallel>], iteration_bounds = array<i64: 2, 1>, scalar_prefetch = 0 : i64, scratch_operands = 0 : i64, tpu.core_type = #tpu.core_type<tc>, window_params = [{transform_indices = @transform_0, window_bounds = array<i64: 1, 16, 48>}, {transform_indices = @transform_1, window_bounds = array<i64: 48, 16>}, {transform_indices = @transform_2, window_bounds = array<i64: 1, 16>}, {transform_indices = @transform_3, window_bounds = array<i64: 16, 16>}, {transform_indices = @transform_4, window_bounds = array<i64: 1, 16, 16>}]} {
    %c0 = arith.constant 0 : index
    %c0_0 = arith.constant 0 : index
    %c0_1 = arith.constant 0 : index
    %0 = vector.load %arg2[%c0, %c0_0, %c0_1] : memref<1x16x48xf32, #tpu.memory_space<vmem>>, vector<1x16x48xf32>
    %1 = vector.shape_cast %0 : vector<1x16x48xf32> to vector<16x48xf32>
    %2 = arith.truncf %1 : vector<16x48xf32> to vector<16x48xbf16>
    %c0_2 = arith.constant 0 : index
    %c0_3 = arith.constant 0 : index
    %3 = vector.load %arg3[%c0_2, %c0_3] : memref<48x16xf32, #tpu.memory_space<vmem>>, vector<48x16xf32>
    %4 = arith.truncf %3 : vector<48x16xf32> to vector<48x16xbf16>
    %cst = arith.constant dense<0.000000e+00> : vector<16x16xf32>
    %5 = tpu.matmul %2, %4, %cst {dimension_numbers = #tpu.dot_dimension_numbers<[1], [0], [0], [1], [0, 0, 1, 1], [], []>} : vector<16x48xbf16>, vector<48x16xbf16>, vector<16x16xf32> -> vector<16x16xf32>
    %c0_4 = arith.constant 0 : index
    %c0_5 = arith.constant 0 : index
    %6 = vector.load %arg4[%c0_4, %c0_5] : memref<1x16xf32, #tpu.memory_space<vmem>>, vector<1x16xf32>
    %7 = vector.broadcast %6 : vector<1x16xf32> to vector<16x16xf32>
    %8 = arith.addf %5, %7 : vector<16x16xf32>
    %c0_6 = arith.constant 0 : index
    %c0_7 = arith.constant 0 : index
    %9 = vector.load %arg5[%c0_6, %c0_7] : memref<16x16xf32, #tpu.memory_space<vmem>>, vector<16x16xf32>
    %10 = arith.addf %8, %9 : vector<16x16xf32>
    %c0_8 = arith.constant 0 : index
    %c0_9 = arith.constant 0 : index
    %c0_10 = arith.constant 0 : index
    %11 = vector.load %arg6[%c0_8, %c0_9, %c0_10] : memref<1x16x16xf32, #tpu.memory_space<vmem>>, vector<1x16x16xf32>
    %12 = vector.shape_cast %11 : vector<1x16x16xf32> to vector<16x16xf32>
    %13 = vector.shape_cast %10 : vector<16x16xf32> to vector<1x16x16xf32>
    tpu.vector_store %arg6[%c0_8, %c0_9, %c0_10], %13 {strides = array<i32>} : memref<1x16x16xf32, #tpu.memory_space<vmem>>, vector<1x16x16xf32>,
    return
  }
  func.func @transform_0(%arg0: i32, %arg1: i32) -> (i32, i32, i32) {
    %c0_i32 = arith.constant 0 : i32
    %c0_i32_0 = arith.constant 0 : i32
    %c0_i32_1 = arith.constant 0 : i32
    return %arg0, %c0_i32, %c0_i32_0 : i32, i32, i32
  }
  func.func @transform_1(%arg0: i32, %arg1: i32) -> (i32, i32) {
    %c0_i32 = arith.constant 0 : i32
    %c0_i32_0 = arith.constant 0 : i32
    return %c0_i32, %arg1 : i32, i32
  }
  func.func @transform_2(%arg0: i32, %arg1: i32) -> (i32, i32) {
    %c0_i32 = arith.constant 0 : i32
    %c0_i32_0 = arith.constant 0 : i32
    return %c0_i32, %arg1 : i32, i32
  }
  func.func @transform_3(%arg0: i32, %arg1: i32) -> (i32, i32) {
    %c0_i32 = arith.constant 0 : i32
    %c0_i32_0 = arith.constant 0 : i32
    return %c0_i32, %arg1 : i32, i32
  }
  func.func @transform_4(%arg0: i32, %arg1: i32) -> (i32, i32, i32) {
    %c0_i32 = arith.constant 0 : i32
    %c0_i32_0 = arith.constant 0 : i32
    return %arg0, %c0_i32, %arg1 : i32, i32, i32
  }
}

</mosaic_0001>

<bundles_post_ra>
// kernel: tpu_custom_call.1
= control target key start
LH: loop header
LB: loop body
LE: loop exit
PB: predicated region body
PF: predicated region fallthrough
CT: control target
= control target key end

     0   :  { %9 = vsyncpa [#allocation3], 0  ;;  %s739_s0 = inlined_call_operand.vmem [shape: f32[2,16,48], index: 0, kind: input, shape index: {}]   ;;  %s740_s1 = inlined_call_operand.vmem [shape: f32[48,16], index: 1, kind: input, shape index: {}]   ;;  %s741_s2 = inlined_call_operand.vmem [shape: f32[1,16], index: 2, kind: input, shape index: {}]   ;;  %s742_s3 = inlined_call_operand.vmem [shape: f32[16,16], index: 3, kind: input, shape index: {}]   ;;  %s743_s4 = inlined_call_operand.hbm [shape: f32[2,16,16], index: 4, kind: output, shape index: {}]  }
   0x1   :  { %11 = vsyncpa [#allocation3 + $0x1], 0  ;;  %s615_s15 = smov 0   ;;  %s617_s16 = smov 0  }
   0x2   :  { %s619_s17 = smov 0   ;;  %s621_s18 = smov 0  }
   0x3   :  { %s623_s19 = smov 0   ;;  %s625_s20 = smov 0  }
   0x4 LB: > { %s431_s21 = sadd.s32 4294967295, %s586_s20   ;;  %s432_s22 = sadd.s32 4294967294, %s586_s20   ;;  %s586_s20 = sphi %s625_s20, %s17_s20   ;;  %s582_s19 = sphi %s623_s19, %s750_s19   ;;  %s578_s18 = sphi %s621_s18, %s749_s18   ;;  %s574_s17 = sphi %s619_s17, %s748_s17   ;;  %s570_s16 = sphi %s617_s16, %s747_s16   ;;  %s566_s15 = sphi %s615_s15, %s746_s15  }
   0x5   : > { %s29_s23 = sadd.s32 1, %s582_s19  ;;  %s142_s24 = sadd.s32 1, %s574_s17 }
   0x6   : > { %p31_p0 = scmp.ge.s32.totalorder %s29_s23, 2  ;;  %p152_p1 = scmp.ne.s32.totalorder %s574_s17, %s570_s16 }
   0x7   : > { %p153_p2 = scmp.eq.s32.totalorder %s431_s21, 1  ;;  %p158_p3 = scmp.ne.s32.totalorder %s570_s16, %s566_s15 }
   0x8   : > { %s752_s23 = smov (%p31_p0, %s29_s23), 0  ;;  %p159_p5 = scmp.eq.s32.totalorder %s432_s22, 1 }
   0x9   : > { %p655_p4 = por %p153_p2, %p152_p1  ;;  %s137_s26 = ssub.s32 %s582_s19, %s752_s23 }
   0xa   : > { %p438_p6 = scmp.ge.s32.totalorder %s586_s20, 1  ;;  %p140_p7 = scmp.eq.s32.totalorder %s137_s26, 0 }
   0xb   : > { %p662_p8 = por %p159_p5, %p158_p3  ;;  %p205_p9 = scmp.lt.s32.totalorder %s586_s20, 3 }
   0xc   : > { %s668_s28 = scalar_select %p140_p7, %s574_s17, %s142_s24  }
   0xd   : > { %p206_p10 = pnand %p438_p6, %p205_p9 }
   0xe   : > { %p242_p11 = scmp.lt.s32.totalorder (!%p206_p10), %s578_s18, 1  ;;  %s239_s30 = sand.u32 (!%p206_p10), 1, %s570_s16  }
   0xf   : > { %209 = sbr.rel (%p206_p10) target bundleno = 176 (0xb0), region = 36  ;;  %s439_s7 = sshll.u32 (!%p206_p10), %s239_s30, 4 }
  0x10   : > { %s449_s10 = sshll.u32 (!%p206_p10), %s578_s18, 4  ;;  %s241_s14 = scalar_lea.vmem (!%p206_p10), [#allocation2], %s439_s7 }
  0x11   : > { %s313_s13 = scalar_lea.hbm (!%p206_p10), %s743_s4, %s449_s10  ;;  %s314_s21 = sshll.u32 (!%p206_p10), %s241_s14, 4  ;;  %s315_s21 = int_to_ptr.vmem [resolvable:$true] %s314_s21 }
  0x12   : > { %s528_s8 = scalar_lea.hbm (!%p206_p10), %s743_s4, 32 }
  0x14   : > { %v266_v0 = vld [vmem:[%s740_s1 + $0x20] sm:$0xff]  ;;  %v267_v1 = vld [vmem:[%s740_s1 + $0x28] sm:$0xff]  ;;  %v264_v2 = vld [vmem:[%s740_s1 + $0x10] sm:$0xff]  ;;  %s243_s11 = scalar_select %p242_p11, %s578_s18, 1  ;;  %vm275_vm0 = vcmask 392192   ;;  %vm297_vm1 = vcmask 130048  }
  0x15   : > { %v270_v3 = vpack.c.bf16 %v267_v1, %v266_v0  ;;  %v265_v4 = vld [vmem:[%s740_s1 + $0x18] sm:$0xff]  ;;  %v262_v6 = vld [vmem:[%s740_s1] sm:$0xff]  ;;  %v263_v7 = vld [vmem:[%s740_s1 + $0x8] sm:$0xff]  ;;  %s301_s18 = scalar_lea.sflag [#allocation3], %s239_s30 }
  0x16   : > { %v269_v5 = vpack.c.bf16 %v265_v4, %v264_v2  ;;  %s448_s22 = sshll.u32 %s243_s11, 4  ;;  %v268_v8 = vpack.c.bf16 %v263_v7, %v262_v6  ;;  %v507_v12 = vld [vmem:[%s741_s2] ss:$0 sm:$0xff]  ;;  %v294_v18 = vld [vmem:[%s742_s3 + $0x8] sm:$0xff] }
  0x17   : > { %284 = vmatpush.bf16.msra.mxu0 %v270_v3  ;;  %s246_s29 = scalar_lea.vmem %s739_s0, %s448_s22  ;;  %v293_v14 = vld [vmem:[%s742_s3] sm:$0xff]  ;;  %s316_s22 = sshll.u32 %s313_s13, 4  ;;  %s317_s22 = int_to_ptr.hbm [resolvable:$true] %s316_s22 }
  0x18   : > { %v259_v9 = vld [vmem:[%s246_s29] sm:$0xff]  ;;  %v260_v10 = vld [vmem:[%s246_s29 + $0x8] sm:$0xff]  ;;  %s522_s29 = sshra.s32 %s317_s22, 4  ;;  %s523_s29 = int_to_ptr.hbm [resolvable:$true] %s522_s29 }
  0x19   : > { %v261_v11 = vpack.c.bf16 %v260_v10, %v259_v9  ;;  %s524_s5 = scalar_lea.hbm %s523_s29, 16  ;;  %p529_p1 = scmp.lt.s32.totalorder %s523_s29, %s743_s4 }
  0x1a   : > { %p525_p12 = scmp.ne.s32.totalorder %s523_s29, %s524_s5  ;;  %p530_p2 = scmp.lt.s32.totalorder %s528_s8, %s524_s5 }
  0x1b   : > { %285 = vmatpush.bf16.msra.mxu0 %v269_v5 }
  0x1c   : > { %p526_p13 = pnand %p525_p12, %p655_p4  ;;  %p531_p3 = por %p530_p2, %p529_p1 }
  0x1e   : > { %p527_p0 = pneg %p526_p13 }
  0x1f   : > { %286 = vmatpush.bf16.msra.mxu0 %v268_v8 }
  0x20   : > { %p532_p5 = pnand %p531_p3, %p527_p0 }
  0x22   : > { %442 = vmatmul.msk.bf16.vlgmr.msra.gmra.mxu0 %vm275_vm0, %v261_v11 }
  0x9f   : > { %v288_v13 = vpop.f32.mrf.mxu0 }
  0xa0   : > { %v289_v15 = vadd.f32 %v507_v12, %v288_v13 }
  0xa2   : > { %v295_v16 = vadd.f32 %v293_v14, %v289_v15 }
  0xa4   : > { %298 = vst.msk [vmem:[%s241_s14] sm:$0xff] %vm297_vm1, %v295_v16 }
  0xa7   : > { %v290_v17 = vpop.f32.mrf.mxu0 }
  0xa8   : > { %v291_v19 = vadd.f32 %v507_v12, %v290_v17 }
  0xaa   : > { %v296_v20 = vadd.f32 %v294_v18, %v291_v19 }
  0xac   : > { %299 = vst.msk [vmem:[%s241_s14 + $0x8] sm:$0xff] %vm297_vm1, %v296_v20 }
  0xad   : > { %535 = shalt.err (!%p532_p5)
}
  0xae   : > { %s588_s30 = smov 128   ;;  %s589_s11 = smov 8  }
  0xaf   : > { %450 = dma.vmem_to_hbm [thread:$0]  (%p655_p4), %s315_s21, 256, %s317_s22, %s301_s18, %s588_s30, %s588_s30, %s589_s11  }
  0xb0 PF: > { %p456_p6 = scmp.ge.s32.totalorder %s586_s20, 2  ;;  %s331_s12 = sand.u32 1, %s566_s15  }
  0xb1   : > { %s332_s13 = scalar_lea.sflag [#allocation3], %s331_s12 }
  0xb2   : > { %p453_p7 = pnand %p456_p6, %p662_p8 }
  0xb4   : > { %p454_p9 = pneg %p453_p7 }
  0xb6   : > { %561 = dma.done.wait (%p454_p9), %s332_s13, 256  }
  0xb7   : > { %563 = vsyncadd (%p454_p9), %s332_s13, 4294967040  ;;  %s17_s20 = sadd.s32 1, %s586_s20   ;;  %s746_s15 = smov %s570_s16 }
  0xb8   : > { %p14_p10 = scmp.ge.s32.totalorder %s17_s20, 4   ;;  %s747_s16 = smov %s574_s17 }
  0xb9   : > { %s748_s17 = smov %s668_s28  ;;  %s749_s18 = smov %s582_s19 }
  0xba   : > { %s750_s19 = smov %s752_s23  ;;  %16 = sbr.rel (!%p14_p10) target bundleno = 4 (0x4), region = 80 }
  0xbf   :  { %338 = vsyncpa [#allocation3], 1 }
  0xc0   :  { %340 = vsyncpa [#allocation3 + $0x1], 1 }

</bundles_post_ra>
